<compile_context>
chip_gen: v5e
topology: v5e:2x2
jax: 0.10.0
libtpu: 0.0.40
codegen_flags: <defaults>
</compile_context>

<pallas_src>
import functools

import jax
import jax.numpy as jnp
from jax import lax
from jax.experimental import pallas as pl
from jax.experimental.pallas import tpu as pltpu


# ---------------------------------------------------------------------------
# Helpers
# ---------------------------------------------------------------------------
def _ceil_div(a, b):
    return -(-a // b)


def _tile_and_pad(dim, target, align):
    """Choose (tile, padded_dim) with tile | padded_dim and tile aligned.

    Small dims are left untiled/unpadded (a full-dim block is always legal).
    Otherwise prefer the largest aligned tile whose zero-padding overhead is
    <= 12.5% of the dim; fall back to align-sized tiles (minimal padding)."""
    if dim <= target:
        return dim, dim
    t = max(align, (target // align) * align)
    for cand in range(t, align - 1, -align):
        pad = _ceil_div(dim, cand) * cand - dim
        if pad * 8 <= dim:
            return cand, dim + pad
    return align, _ceil_div(dim, align) * align


def _largest_divisor_leq(n, cap):
    cap = max(1, min(n, cap))
    for d in range(cap, 0, -1):
        if n % d == 0:
            return d
    return 1


def _pad2(x, rows, cols):
    r, c = x.shape
    if r == rows and c == cols:
        return x
    return jnp.pad(x, ((0, rows - r), (0, cols - c)))


def _vmem_limit_bytes():
    """~half of physical VMEM, capped at 96 MiB, never below the 32 MiB default.

    -> ~64 MiB on v5e/v6e (128 MiB physical), 32 MiB on v7x (64 MiB physical)."""
    try:
        cap = int(pltpu.get_tpu_info().vmem_capacity_bytes)
    except Exception:
        cap = 128 * 1024 * 1024
    return max(32 * 1024 * 1024, min(96 * 1024 * 1024, cap // 2))


# ---------------------------------------------------------------------------
# Single-step kernels (accumulate directly into the f32 output block)
# ---------------------------------------------------------------------------
def _lif_step_kernel(z_ref, w_ref, b_ref, vd_ref, vprev_ref, vout_ref):
    # grid = (batch tiles, size tiles, K tiles); K is the reduction axis (last).
    # Output block index (i, j) is constant across k -> resident accumulator.
    k = pl.program_id(2)

    @pl.when(k == 0)
    def _init():
        vout_ref[...] = jnp.zeros_like(vout_ref)

    vout_ref[...] += jnp.dot(z_ref[...], w_ref[...],
                             preferred_element_type=jnp.float32)

    @pl.when(k == pl.num_programs(2) - 1)
    def _finalize():
        vout_ref[...] = (vprev_ref[...] * vd_ref[...]
                         + vout_ref[...] + b_ref[...])


def _lif_step_kernel_nostate(z_ref, w_ref, b_ref, vout_ref):
    # state=None path: v = 0 * v_decay + i == i ; no vprev / v_decay DMA at all.
    k = pl.program_id(2)

    @pl.when(k == 0)
    def _init():
        vout_ref[...] = jnp.zeros_like(vout_ref)

    vout_ref[...] += jnp.dot(z_ref[...], w_ref[...],
                             preferred_element_type=jnp.float32)

    @pl.when(k == pl.num_programs(2) - 1)
    def _finalize():
        vout_ref[...] = vout_ref[...] + b_ref[...]


def lif_no_thres_forward(z, w, b, v_decay, state_v=None, *,
                         compute_dtype=jnp.bfloat16,
                         tm_target=256, tn_target=512, tk_target=1024):
    """Single LIF_no_thres forward step.

    z:       [batch, in_features]
    w:       [size, in_features]   (PyTorch nn.Linear layout)
    b:       [size]
    v_decay: [size]
    state_v: optional [batch, size] previous membrane potential (None -> zero state).

    Returns (v, {'v': v}) mirroring LIFState_no_thresh.  compute_dtype controls the
    matmul-input dtype only (accumulation and the decay epilogue are always f32);
    pass jnp.float32 for bit-closer matching of the PyTorch reference.
    """
    batch, in_features = z.shape
    size, kw = w.shape
    assert kw == in_features

    itemsize = jnp.dtype(compute_dtype).itemsize
    m_align = 16 if itemsize < 4 else 8     # bf16 sublane packing is (16, 128)

    # Megacore: with a single batch tile, keep >= 2 size tiles so both v7x
    # TensorCores get work along the 'parallel' size axis.
    tn_tgt = tn_target
    if batch <= tm_target and size >= 256:
        tn_tgt = min(tn_tgt, max(128, (size // 2 // 128) * 128))

    tm, pm = _tile_and_pad(batch, tm_target, m_align)
    tn, pn = _tile_and_pad(size, tn_tgt, 128)
    tk, pk = _tile_and_pad(in_features, tk_target, 128)
    grid = (pm // tm, pn // tn, pk // tk)

    # Canonical (K, N) weight layout: the one-time transpose of a reused parameter
    # is cheaper than risking a per-tile XLU transpose on the MXU feed path.
    z_c = _pad2(z.astype(compute_dtype), pm, pk)
    w_c = _pad2(w.T.astype(compute_dtype), pk, pn)
    b2 = _pad2(b.reshape(1, size).astype(jnp.float32), 1, pn)
    vd2 = _pad2(v_decay.reshape(1, size).astype(jnp.float32), 1, pn)

    flops = 2 * batch * in_features * size
    # W is streamed once per batch tile (grid i), z once per size tile (grid j).
    bytes_accessed = (grid[1] * batch * in_features * itemsize
                      + grid[0] * size * in_features * itemsize
                      + (2 * size + 2 * batch * size) * 4)
    cost = pl.CostEstimate(flops=flops, transcendentals=0,
                           bytes_accessed=int(bytes_accessed))

    in_specs = [
        pl.BlockSpec((tm, tk), lambda i, j, k: (i, k)),    # z
        pl.BlockSpec((tk, tn), lambda i, j, k: (k, j)),    # W.T  (K, N)
        pl.BlockSpec((1, tn), lambda i, j, k: (0, j)),     # bias
    ]
    out_spec = pl.BlockSpec((tm, tn), lambda i, j, k: (i, j))
    cparams = pltpu.CompilerParams(
        dimension_semantics=("parallel", "parallel", "arbitrary"),
        vmem_limit_bytes=_vmem_limit_bytes(),
    )

    if state_v is None:
        v_pad = pl.pallas_call(
            _lif_step_kernel_nostate,
            out_shape=jax.ShapeDtypeStruct((pm, pn), jnp.float32),
            grid_spec=pltpu.PrefetchScalarGridSpec(
                num_scalar_prefetch=0, grid=grid,
                in_specs=in_specs, out_specs=out_spec),
            compiler_params=cparams,
            cost_estimate=cost,
        )(z_c, w_c, b2)
    else:
        vprev = _pad2(state_v.astype(jnp.float32), pm, pn)
        v_pad = pl.pallas_call(
            _lif_step_kernel,
            out_shape=jax.ShapeDtypeStruct((pm, pn), jnp.float32),
            grid_spec=pltpu.PrefetchScalarGridSpec(
                num_scalar_prefetch=0, grid=grid,
                in_specs=in_specs + [
                    pl.BlockSpec((1, tn), lambda i, j, k: (0, j)),   # v_decay
                    pl.BlockSpec((tm, tn), lambda i, j, k: (i, j)),  # previous v
                ],
                out_specs=out_spec),
            compiler_params=cparams,
            cost_estimate=cost,
        )(z_c, w_c, b2, vd2, vprev)

    v = v_pad[:batch, :size] if (pm != batch or pn != size) else v_pad
    return v, {"v": v}


# ---------------------------------------------------------------------------
# Fused multi-timestep recurrence: grid = (size tiles, T // Tc)
#   * one MXU matmul over Tc*batch rows per grid step (good MXU row utilization)
#   * decay recurrence scanned inside the block, v carried in VMEM scratch
#   * W tile (K, tn) in compute_dtype stays resident across the whole t sweep
# ---------------------------------------------------------------------------
def _lif_seq_kernel(tc, batch, z_ref, w_ref, b_ref, vd_ref, v0_ref,
                    vseq_ref, v_scr):
    @pl.when(pl.program_id(1) == 0)
    def _init():
        v_scr[...] = v0_ref[...]

    k = z_ref.shape[2]
    # Batched synapse matmul across tc timesteps: (tc*batch, K) @ (K, tn).
    z_flat = z_ref[...].reshape(tc * batch, k)
    i_all = (jnp.dot(z_flat, w_ref[...], preferred_element_type=jnp.float32)
             + b_ref[...])
    i_all = i_all.reshape(tc, batch, i_all.shape[-1])

    vd = vd_ref[...]                                  # (1, tn) -> broadcast
    v = v_scr[...]
    for s in range(tc):                               # static unrolled decay scan
        v = v * vd + i_all[s]
        vseq_ref[s] = v.astype(vseq_ref.dtype)
    v_scr[...] = v


def lif_no_thres_sequence(z_seq, w, b, v_decay, state_v=None, *,
                          compute_dtype=jnp.bfloat16,
                          tn_target=512, mxu_rows_target=256):
    """Applies LIF_no_thres over T timesteps inside a single pallas_call.

    z_seq: [T, batch, in_features].  Returns (v_seq [T, batch, size], {'v': v_seq[-1]}).
    """
    T, batch, in_features = z_seq.shape
    size, kw = w.shape
    assert kw == in_features
    if state_v is None:
        state_v = jnp.zeros((batch, size), jnp.float32)

    # Timesteps per grid step: batch the matmul over tc*batch rows (~256).
    tc = _largest_divisor_leq(T, max(1, mxu_rows_target // max(1, batch)))
    tn, pn = _tile_and_pad(size, tn_target, 128)
    n_tiles = pn // tn

    itemsize = jnp.dtype(compute_dtype).itemsize
    z_c = z_seq.astype(compute_dtype)
    w_c = _pad2(w.T.astype(compute_dtype), in_features, pn)     # (K, N), tiled over N
    b2 = _pad2(b.reshape(1, size).astype(jnp.float32), 1, pn)
    vd2 = _pad2(v_decay.reshape(1, size).astype(jnp.float32), 1, pn)
    v0 = _pad2(state_v.astype(jnp.float32), batch, pn)

    flops = 2 * T * batch * in_features * size
    bytes_accessed = (n_tiles * T * batch * in_features * itemsize   # z per n tile
                      + size * in_features * itemsize                # W once
                      + (2 * size + batch * size + T * batch * size) * 4)

    kernel = functools.partial(_lif_seq_kernel, tc, batch)
    vseq = pl.pallas_call(
        kernel,
        out_shape=jax.ShapeDtypeStruct((T, batch, pn), jnp.float32),
        grid_spec=pltpu.PrefetchScalarGridSpec(
            num_scalar_prefetch=0,
            grid=(n_tiles, T // tc),
            in_specs=[
                pl.BlockSpec((tc, batch, in_features), lambda j, t: (t, 0, 0)),  # z block
                pl.BlockSpec((in_features, tn), lambda j, t: (0, j)),  # W tile, resident over t
                pl.BlockSpec((1, tn), lambda j, t: (0, j)),            # bias
                pl.BlockSpec((1, tn), lambda j, t: (0, j)),            # v_decay
                pl.BlockSpec((batch, tn), lambda j, t: (0, j)),        # initial v
            ],
            out_specs=pl.BlockSpec((tc, batch, tn), lambda j, t: (t, 0, j)),
            scratch_shapes=[pltpu.VMEM((batch, tn), jnp.float32)]),    # carried v
        compiler_params=pltpu.CompilerParams(
            # n-tiles are independent ('parallel' -> megacore); t is a recurrence.
            dimension_semantics=("parallel", "arbitrary"),
            vmem_limit_bytes=_vmem_limit_bytes()),
        cost_estimate=pl.CostEstimate(flops=flops, transcendentals=0,
                                      bytes_accessed=int(bytes_accessed)),
    )(z_c, w_c, b2, vd2, v0)

    if pn != size:
        vseq = vseq[..., :size]
    return vseq, {"v": vseq[-1]}


# ---------------------------------------------------------------------------
# Self-test
# ---------------------------------------------------------------------------
if __name__ == "__main__":
    key = jax.random.PRNGKey(0)
    k_z, k_w, k_b, k_vd, k_v, k_zs = jax.random.split(key, 6)

    batch = 8            # sublane-friendly
    in_features = 32
    size = 128           # lane-dense output width
    T = 6

    z = jax.random.normal(k_z, (batch, in_features), dtype=jnp.float32)
    w = jax.random.normal(k_w, (size, in_features), dtype=jnp.float32) * 0.1
    b = jax.random.normal(k_b, (size,), dtype=jnp.float32) * 0.1
    # v_decay ~ U(0.8, 0.85), matching torch.FloatTensor(size).uniform_(0.8, 0.85)
    v_decay = jax.random.uniform(k_vd, (size,), dtype=jnp.float32,
                                 minval=0.8, maxval=0.85)
    v_prev = jax.random.normal(k_v, (batch, size), dtype=jnp.float32)
    z_seq = jax.random.normal(k_zs, (T, batch, in_features), dtype=jnp.float32)

    # f32 compute paths (tight tolerance vs. reference).
    v0_f, _ = lif_no_thres_forward(z, w, b, v_decay, state_v=None,
                                   compute_dtype=jnp.float32)
    v1_f, st1 = lif_no_thres_forward(z, w, b, v_decay, state_v=v_prev,
                                     compute_dtype=jnp.float32)
    vseq_f, stq_f = lif_no_thres_sequence(z_seq, w, b, v_decay, state_v=None,
                                          compute_dtype=jnp.float32)
    # bf16 performance default (looser tolerance).
    v1_h, _ = lif_no_thres_forward(z, w, b, v_decay, state_v=v_prev)
    vseq_h, _ = lif_no_thres_sequence(z_seq, w, b, v_decay, state_v=None)
    jax.block_until_ready((v0_f, v1_f, vseq_f, v1_h, vseq_h))

    # Pure-JAX references.
    i_ref = z @ w.T + b
    ref0 = i_ref                                       # zero initial state
    ref1 = v_prev * v_decay[None, :] + i_ref

    v_r = jnp.zeros((batch, size), jnp.float32)
    seq_refs = []
    for t in range(T):
        v_r = v_r * v_decay[None, :] + (z_seq[t] @ w.T + b)
        seq_refs.append(v_r)
    ref_seq = jnp.stack(seq_refs)

    assert jnp.allclose(v0_f, ref0, atol=1e-4, rtol=1e-4)
    assert jnp.allclose(v1_f, ref1, atol=1e-4, rtol=1e-4)
    assert jnp.allclose(st1["v"], ref1, atol=1e-4, rtol=1e-4)
    assert jnp.allclose(vseq_f, ref_seq, atol=1e-3, rtol=1e-3)
    assert jnp.allclose(stq_f["v"], ref_seq[-1], atol=1e-3, rtol=1e-3)
    assert jnp.allclose(v1_h, ref1, atol=3e-2, rtol=3e-2)
    assert jnp.allclose(vseq_h, ref_seq, atol=8e-2, rtol=8e-2)

    print("KERNEL_OK")
</pallas_src>

<mosaic_0001>
module attributes {stable_mosaic.version = 11 : i64} {
  func.func @_lif_step_kernel_nostate(%arg0: i32, %arg1: i32, %arg2: i32, %arg3: memref<8x32xf32, #tpu.memory_space<vmem>>, %arg4: memref<32x128xf32, #tpu.memory_space<vmem>>, %arg5: memref<1x128xf32, #tpu.memory_space<vmem>>, %arg6: memref<8x128xf32, #tpu.memory_space<vmem>>) attributes {dimension_semantics = [#tpu.dimension_semantics<parallel>, #tpu.dimension_semantics<parallel>, #tpu.dimension_semantics<arbitrary>], iteration_bounds = array<i64: 1, 1, 1>, scalar_prefetch = 0 : i64, scratch_operands = 0 : i64, tpu.core_type = #tpu.core_type<tc>, window_params = [{transform_indices = @transform_0, window_bounds = array<i64: 8, 32>}, {transform_indices = @transform_1, window_bounds = array<i64: 32, 128>}, {transform_indices = @transform_2, window_bounds = array<i64: 1, 128>}, {transform_indices = @transform_3, window_bounds = array<i64: 8, 128>}]} {
    %c0_i32 = arith.constant 0 : i32
    %0 = arith.cmpi eq, %arg2, %c0_i32 : i32
    %1 = arith.extui %0 : i1 to i32
    %c0_i32_0 = arith.constant 0 : i32
    %2 = arith.cmpi ne, %1, %c0_i32_0 : i32
    scf.if %2 {
      %cst_10 = arith.constant 0.000000e+00 : f32
      %12 = vector.broadcast %cst_10 : f32 to vector<8x128xf32>
      %c0_11 = arith.constant 0 : index
      %c0_12 = arith.constant 0 : index
      %13 = vector.load %arg6[%c0_11, %c0_12] : memref<8x128xf32, #tpu.memory_space<vmem>>, vector<8x128xf32>
      tpu.vector_store %arg6[%c0_11, %c0_12], %12 {strides = array<i32>} : memref<8x128xf32, #tpu.memory_space<vmem>>, vector<8x128xf32>,
    } else {
    }
    %c0 = arith.constant 0 : index
    %c0_1 = arith.constant 0 : index
    %3 = vector.load %arg6[%c0, %c0_1] : memref<8x128xf32, #tpu.memory_space<vmem>>, vector<8x128xf32>
    %c0_2 = arith.constant 0 : index
    %c0_3 = arith.constant 0 : index
    %4 = vector.load %arg3[%c0_2, %c0_3] : memref<8x32xf32, #tpu.memory_space<vmem>>, vector<8x32xf32>
    %c0_4 = arith.constant 0 : index
    %c0_5 = arith.constant 0 : index
    %5 = vector.load %arg4[%c0_4, %c0_5] : memref<32x128xf32, #tpu.memory_space<vmem>>, vector<32x128xf32>
    %cst = arith.constant dense<0.000000e+00> : vector<8x128xf32>
    %6 = tpu.matmul %4, %5, %cst {dimension_numbers = #tpu.dot_dimension_numbers<[1], [0], [0], [1], [0, 0, 1, 1], [], []>} : vector<8x32xf32>, vector<32x128xf32>, vector<8x128xf32> -> vector<8x128xf32>
    %7 = arith.addf %3, %6 : vector<8x128xf32>
    %c0_6 = arith.constant 0 : index
    %c0_7 = arith.constant 0 : index
    %8 = vector.load %arg6[%c0_6, %c0_7] : memref<8x128xf32, #tpu.memory_space<vmem>>, vector<8x128xf32>
    tpu.vector_store %arg6[%c0_6, %c0_7], %7 {strides = array<i32>} : memref<8x128xf32, #tpu.memory_space<vmem>>, vector<8x128xf32>,
    %c0_i32_8 = arith.constant 0 : i32
    %9 = arith.cmpi eq, %arg2, %c0_i32_8 : i32
    %10 = arith.extui %9 : i1 to i32
    %c0_i32_9 = arith.constant 0 : i32
    %11 = arith.cmpi ne, %10, %c0_i32_9 : i32
    scf.if %11 {
      %c0_10 = arith.constant 0 : index
      %c0_11 = arith.constant 0 : index
      %12 = vector.load %arg6[%c0_10, %c0_11] : memref<8x128xf32, #tpu.memory_space<vmem>>, vector<8x128xf32>
      %c0_12 = arith.constant 0 : index
      %c0_13 = arith.constant 0 : index
      %13 = vector.load %arg5[%c0_12, %c0_13] : memref<1x128xf32, #tpu.memory_space<vmem>>, vector<1x128xf32>
      %14 = vector.broadcast %13 : vector<1x128xf32> to vector<8x128xf32>
      %15 = arith.addf %12, %14 : vector<8x128xf32>
      %c0_14 = arith.constant 0 : index
      %c0_15 = arith.constant 0 : index
      %16 = vector.load %arg6[%c0_14, %c0_15] : memref<8x128xf32, #tpu.memory_space<vmem>>, vector<8x128xf32>
      tpu.vector_store %arg6[%c0_14, %c0_15], %15 {strides = array<i32>} : memref<8x128xf32, #tpu.memory_space<vmem>>, vector<8x128xf32>,
    } else {
    }
    return
  }
  func.func @transform_0(%arg0: i32, %arg1: i32, %arg2: i32) -> (i32, i32) {
    %c0_i32 = arith.constant 0 : i32
    return %arg0, %arg2 : i32, i32
  }
  func.func @transform_1(%arg0: i32, %arg1: i32, %arg2: i32) -> (i32, i32) {
    %c0_i32 = arith.constant 0 : i32
    return %arg2, %arg1 : i32, i32
  }
  func.func @transform_2(%arg0: i32, %arg1: i32, %arg2: i32) -> (i32, i32) {
    %c0_i32 = arith.constant 0 : i32
    %c0_i32_0 = arith.constant 0 : i32
    return %c0_i32, %arg1 : i32, i32
  }
  func.func @transform_3(%arg0: i32, %arg1: i32, %arg2: i32) -> (i32, i32) {
    %c0_i32 = arith.constant 0 : i32
    return %arg0, %arg1 : i32, i32
  }
}

</mosaic_0001>

<bundles_post_ra>
// kernel: tpu_custom_call.1
= control target key start
LH: loop header
LB: loop body
LE: loop exit
PB: predicated region body
PF: predicated region fallthrough
CT: control target
= control target key end

     0   :  { %8 = vsyncpa [#allocation3], 0  ;;  %s233_s0 = inlined_call_operand.hbm [shape: f32[8,32], index: 0, kind: input, shape index: {}]   ;;  %s234_s1 = inlined_call_operand.hbm [shape: f32[32,128], index: 1, kind: input, shape index: {}]   ;;  %s235_s2 = inlined_call_operand.vmem [shape: f32[1,128], index: 2, kind: input, shape index: {}]   ;;  %s236_s3 = inlined_call_operand.hbm [shape: f32[8,128], index: 3, kind: output, shape index: {}]  }
   0x1   :  { %9 = vsyncpa [#allocation6], 0 }
   0x2   :  { %10 = vsyncpa [#allocation4], 0  ;;  %s16_s14 = sshll.u32 %s233_s0, 4  ;;  %s196_s15 = smov [#allocation2]   ;;  %s17_s14 = int_to_ptr.hbm [resolvable:$true] %s16_s14 }
   0x3   :  { %s18_s16 = sshll.u32 %s196_s15, 4  ;;  %s26_s19 = sshll.u32 %s234_s1, 4  ;;  %s19_s16 = int_to_ptr.vmem [resolvable:$true] %s18_s16  ;;  %s27_s19 = int_to_ptr.hbm [resolvable:$true] %s26_s19 }
   0x4   :  { %21 = dma.hbm_to_vmem [thread:$0]  %s17_s14, 128, %s19_s16, [#allocation3]  }
   0x5   :  { %s197_s20 = smov [#allocation5]   ;;  %s198_s22 = smov 128  }
   0x6   :  { %s28_s21 = sshll.u32 %s197_s20, 4  ;;  %s199_s23 = smov 8   ;;  %s29_s21 = int_to_ptr.vmem [resolvable:$true] %s28_s21 }
   0x7   :  { %34 = dma.hbm_to_vmem [thread:$0]  %s27_s19, 512, %s29_s21, [#allocation6], %s198_s22, %s198_s22, %s199_s23  }
   0x8   :  { %190 = dma.done.wait [#allocation3], 128  }
   0x9   :  { %191 = vsyncadd [#allocation3], 4294967168 }
   0xa   :  { %192 = dma.done.wait [#allocation6], 512  }
   0xb   :  { %193 = vsyncadd [#allocation6], 4294966784  ;;  %v55_v0 = vld [vmem:[#allocation5 + $0x18] sm:$0xff]  ;;  %v54_v1 = vld [vmem:[#allocation5 + $0x10] sm:$0xff]  ;;  %vm56_vm0 = vcmask 261120   ;;  %s200_s24 = smov [#allocation7]  }
   0xc   :  { %72 = vmatpush.msra.mxu0 %v55_v0  ;;  %v53_v2 = vld [vmem:[#allocation5 + $0x8] sm:$0xff]  ;;  %v52_v3 = vld [vmem:[#allocation5] sm:$0xff]  ;;  %v51_v4 = vld [vmem:[#allocation2] sm:$0xff]  ;;  %s97_s25 = sshll.u32 %s200_s24, 4  ;;  %s99_s28 = sshll.u32 %s236_s3, 4  ;;  %s98_s25 = int_to_ptr.vmem [resolvable:$true] %s97_s25  ;;  %s100_s28 = int_to_ptr.hbm [resolvable:$true] %s99_s28 }
   0xd   :  { %v117_v5 = vld [vmem:[%s235_s2] ss:$0 sm:$0xff] }
   0xe   :  { %73 = vmatpush.msra.mxu0 %v54_v1 }
  0x10   :  { %74 = vmatpush.msra.mxu0 %v53_v2 }
  0x12   :  { %75 = vmatpush.msra.mxu0 %v52_v3 }
  0x13   :  { %110 = vmatmul.msk.f32.vlgmr.msra.gmra.mxu0 %vm56_vm0, %v51_v4 }
  0x90   :  { %v77_v6 = vpop.f32.mrf.mxu0 }
  0x91   :  { %v90_v7 = vadd.f32 %v117_v5, %v77_v6 }
  0x93   :  { %91 = vst [vmem:[#allocation7] sm:$0xff] %v90_v7 }
  0x94   :  { %102 = dma.vmem_to_hbm [thread:$0]  %s98_s25, 128, %s100_s28, [#allocation4]  }
  0x95   :  { %194 = dma.done.wait [#allocation4], 128  }
  0x96   :  { %195 = vsyncadd [#allocation4], 4294967168 }
  0x97   :  { %107 = vsyncpa [#allocation3], 1 }
  0x98   :  { %108 = vsyncpa [#allocation6], 1 }
  0x99   :  { %109 = vsyncpa [#allocation4], 1 }

</bundles_post_ra>
